<compile_context>
chip_gen: v7x
topology: tpu7x:2x2x1
jax: 0.10.0
libtpu: 0.0.40
codegen_flags: <defaults>
</compile_context>

<pallas_src>
import functools
import math

import jax
import jax.numpy as jnp
from jax.experimental import pallas as pl
from jax.experimental.pallas import tpu as pltpu


# --------------------------------- kernel ------------------------------------

def pos_enc_kernel(noise_ref, freqs_ref, phase_ref, out_ref):
    """noise_ref: (tb, 1) f32; freqs/phase: (1, dim) f32; out_ref: (tb, dim)."""
    nl = noise_ref[...]                               # (tb, 1)
    # (tb, 1) x (1, dim) broadcast: one mul, one add, one sin per element.
    arg = nl * freqs_ref[...] + phase_ref[...]        # (tb, dim)
    out_ref[...] = jnp.sin(arg).astype(out_ref.dtype)


# -------------------------------- wrapper ------------------------------------

def _choose_tile(batch_padded8, dim):
    """Pick a batch tile: multiple of 8, big, VMEM-safe, >=2 grid steps if possible."""
    # Cap the per-buffer output tile at ~1 MiB so 2x-buffered blocks are tiny
    # even for v5e's 16 MiB scoped-VMEM default.
    tb_cap = max(8, min(1024, ((1 << 20) // (4 * dim)) // 8 * 8))
    tb = min(tb_cap, batch_padded8)
    # Prefer at least 2 grid steps so the parallel axis shards across the two
    # TensorCores on v7x (no effect on v5e/v6e).
    if pl.cdiv(batch_padded8, tb) < 2 and batch_padded8 >= 16:
        tb = max(8, (batch_padded8 // 2) // 8 * 8)
    return tb


@functools.partial(jax.jit, static_argnames=("dim",))
def positional_encoding(noise_level, dim):
    """noise_level: (B,) or (B, 1).  Returns (B, dim) float32 encoding."""
    assert dim % 2 == 0, "PositionalEncoding requires an even dim"
    half = dim // 2

    nl = noise_level.reshape(-1, 1).astype(jnp.float32)
    B = nl.shape[0]

    # Pad the batch to a multiple of the tile; padded rows compute garbage that
    # is sliced off below.
    B8 = pl.cdiv(B, 8) * 8
    tb = _choose_tile(B8, dim)
    grid_n = pl.cdiv(B8, tb)
    B_pad = grid_n * tb
    nl_pad = jnp.pad(nl, ((0, B_pad - B), (0, 0)))

    # Lane-only constants, computed once (B-independent) and kept resident in
    # VMEM across all grid steps.
    k = jnp.arange(half, dtype=jnp.float32)
    freq_half = jnp.exp(jnp.float32(-math.log(10000.0)) * k * jnp.float32(1.0 / half))
    freqs = jnp.concatenate([freq_half, freq_half]).reshape(1, dim)
    phase = jnp.concatenate(
        [jnp.zeros((half,), jnp.float32),
         jnp.full((half,), jnp.float32(math.pi / 2))]).reshape(1, dim)

    out = pl.pallas_call(
        pos_enc_kernel,
        out_shape=jax.ShapeDtypeStruct((B_pad, dim), jnp.float32),
        grid_spec=pltpu.PrefetchScalarGridSpec(
            num_scalar_prefetch=0,
            grid=(grid_n,),
            in_specs=[
                pl.BlockSpec((tb, 1), lambda i: (i, 0)),     # noise tile
                pl.BlockSpec((1, dim), lambda i: (0, 0)),    # freqs (resident)
                pl.BlockSpec((1, dim), lambda i: (0, 0)),    # phase (resident)
            ],
            out_specs=pl.BlockSpec((tb, dim), lambda i: (i, 0)),
        ),
        compiler_params=pltpu.CompilerParams(
            dimension_semantics=("parallel",)),
    )(nl_pad, freqs, phase)

    return out[:B]


# ---------------------------- pure-JAX reference ------------------------------

def ref_positional_encoding(noise_level, dim):
    count = dim // 2
    nl = noise_level.reshape(-1).astype(jnp.float32)
    step = jnp.arange(count, dtype=jnp.float32) / count
    enc = nl[:, None] * jnp.exp(-math.log(10000.0) * step[None, :])
    return jnp.concatenate([jnp.sin(enc), jnp.cos(enc)], axis=-1)


# ----------------------------------- main -------------------------------------

if __name__ == "__main__":
    import numpy as np

    # Main test: B=16, dim=64 -> two 8-row tiles (exercises the batch grid).
    DIM, B = 64, 16
    noise_level = jax.random.uniform(jax.random.PRNGKey(0), (B,), jnp.float32)
    out = jax.block_until_ready(positional_encoding(noise_level, DIM))
    ref = ref_positional_encoding(noise_level, DIM)
    assert out.shape == (B, DIM), out.shape
    np.testing.assert_allclose(np.asarray(out), np.asarray(ref),
                               rtol=1e-5, atol=1e-5)

    # Ragged batch (not a multiple of 8) + small dim: padding path.
    nl2 = jax.random.uniform(jax.random.PRNGKey(1), (5,), jnp.float32)
    out2 = jax.block_until_ready(positional_encoding(nl2, 32))
    ref2 = ref_positional_encoding(nl2, 32)
    assert out2.shape == (5, 32), out2.shape
    np.testing.assert_allclose(np.asarray(out2), np.asarray(ref2),
                               rtol=1e-5, atol=1e-5)

    # Lane-dense dim (multiple of 128) + ragged batch needing padding.
    nl3 = jax.random.uniform(jax.random.PRNGKey(2), (37,), jnp.float32)
    out3 = jax.block_until_ready(positional_encoding(nl3, 128))
    ref3 = ref_positional_encoding(nl3, 128)
    assert out3.shape == (37, 128), out3.shape
    np.testing.assert_allclose(np.asarray(out3), np.asarray(ref3),
                               rtol=1e-5, atol=1e-5)

    print("KERNEL_OK")
</pallas_src>

<mosaic_0001>
module attributes {stable_mosaic.version = 11 : i64} {
  func.func @pos_enc_kernel(%arg0: i32, %arg1: memref<8x1xf32, #tpu.memory_space<vmem>>, %arg2: memref<1x64xf32, #tpu.memory_space<vmem>>, %arg3: memref<1x64xf32, #tpu.memory_space<vmem>>, %arg4: memref<8x64xf32, #tpu.memory_space<vmem>>) attributes {dimension_semantics = [#tpu.dimension_semantics<parallel>], iteration_bounds = array<i64: 2>, scalar_prefetch = 0 : i64, scratch_operands = 0 : i64, tpu.core_type = #tpu.core_type<tc>, window_params = [{transform_indices = @transform_0, window_bounds = array<i64: 8, 1>}, {pipeline_mode = #tpu.pipeline_mode<synchronous>, transform_indices = @transform_1, window_bounds = array<i64: 1, 64>}, {pipeline_mode = #tpu.pipeline_mode<synchronous>, transform_indices = @transform_2, window_bounds = array<i64: 1, 64>}, {transform_indices = @transform_3, window_bounds = array<i64: 8, 64>}]} {
    %c0 = arith.constant 0 : index
    %c0_0 = arith.constant 0 : index
    %0 = vector.load %arg1[%c0, %c0_0] : memref<8x1xf32, #tpu.memory_space<vmem>>, vector<8x1xf32>
    %c0_1 = arith.constant 0 : index
    %c0_2 = arith.constant 0 : index
    %1 = vector.load %arg2[%c0_1, %c0_2] : memref<1x64xf32, #tpu.memory_space<vmem>>, vector<1x64xf32>
    %2 = vector.broadcast %0 : vector<8x1xf32> to vector<8x64xf32>
    %3 = vector.broadcast %1 : vector<1x64xf32> to vector<8x64xf32>
    %4 = arith.mulf %2, %3 : vector<8x64xf32>
    %c0_3 = arith.constant 0 : index
    %c0_4 = arith.constant 0 : index
    %5 = vector.load %arg3[%c0_3, %c0_4] : memref<1x64xf32, #tpu.memory_space<vmem>>, vector<1x64xf32>
    %6 = vector.broadcast %5 : vector<1x64xf32> to vector<8x64xf32>
    %7 = arith.addf %4, %6 : vector<8x64xf32>
    %8 = math.sin %7 : vector<8x64xf32>
    %c0_5 = arith.constant 0 : index
    %c0_6 = arith.constant 0 : index
    %9 = vector.load %arg4[%c0_5, %c0_6] : memref<8x64xf32, #tpu.memory_space<vmem>>, vector<8x64xf32>
    tpu.vector_store %arg4[%c0_5, %c0_6], %8 {strides = array<i32>} : memref<8x64xf32, #tpu.memory_space<vmem>>, vector<8x64xf32>,
    return
  }
  func.func @transform_0(%arg0: i32) -> (i32, i32) {
    %c0_i32 = arith.constant 0 : i32
    %c0_i32_0 = arith.constant 0 : i32
    return %arg0, %c0_i32 : i32, i32
  }
  func.func @transform_1(%arg0: i32) -> (i32, i32) {
    %c0_i32 = arith.constant 0 : i32
    %c0_i32_0 = arith.constant 0 : i32
    %c0_i32_1 = arith.constant 0 : i32
    return %c0_i32, %c0_i32_0 : i32, i32
  }
  func.func @transform_2(%arg0: i32) -> (i32, i32) {
    %c0_i32 = arith.constant 0 : i32
    %c0_i32_0 = arith.constant 0 : i32
    %c0_i32_1 = arith.constant 0 : i32
    return %c0_i32, %c0_i32_0 : i32, i32
  }
  func.func @transform_3(%arg0: i32) -> (i32, i32) {
    %c0_i32 = arith.constant 0 : i32
    %c0_i32_0 = arith.constant 0 : i32
    return %arg0, %c0_i32 : i32, i32
  }
}

</mosaic_0001>

<bundles_post_ra>
// kernel: positional_encoding.1
= control target key start
LH: loop header
LB: loop body
LE: loop exit
PB: predicated region body
PF: predicated region fallthrough
CT: control target
= control target key end

     0   :  { %8 = vsyncpa [#allocation3], 0  ;;  %s657_s0 = inlined_call_operand.vmem [shape: f32[16,1], index: 0, kind: input, shape index: {}]   ;;  %s658_s1 = inlined_call_operand.vmem [shape: f32[1,64], index: 1, kind: input, shape index: {}]   ;;  %s659_s2 = inlined_call_operand.vmem [shape: f32[1,64], index: 2, kind: input, shape index: {}]   ;;  %s660_s3 = inlined_call_operand.hbm [shape: f32[16,64], index: 3, kind: output, shape index: {}]  }
   0x1   :  { %10 = vsyncpa [#allocation3 + $0x1], 0  ;;  %s530_s12 = smov 0   ;;  %s532_s13 = smov 0  }
   0x2   :  { %s534_s14 = smov 0   ;;  %s536_s15 = smov 0  }
   0x3 LB: > { %s551_s16 = sadd.s32 4294967295, %s500_s15   ;;  %s367_s17 = sadd.s32 4294967294, %s500_s15   ;;  %s500_s15 = sphi %s536_s15, %s666_s15   ;;  %s496_s14 = sphi %s534_s14, %s665_s14   ;;  %s492_s13 = sphi %s532_s13, %s664_s13   ;;  %s488_s12 = sphi %s530_s12, %s663_s12  }
   0x4   : > { %s555_s18 = sadd.s32 1, %s500_s15   ;;  %s91_s19 = sadd.s32 1, %s496_s14 }
   0x5   : > { %s88_s20 = ssub.s32 %s500_s15, %s555_s18  ;;  %p101_p0 = scmp.ne.s32.totalorder %s496_s14, %s492_s13 }
   0x6   : > { %p89_p1 = scmp.eq.s32.totalorder %s88_s20, 0  ;;  %p102_p2 = scmp.eq.s32.totalorder %s551_s16, 1 }
   0x7   : > { %p107_p3 = scmp.ne.s32.totalorder %s492_s13, %s488_s12  ;;  %p108_p4 = scmp.eq.s32.totalorder %s367_s17, 1 }
   0x8   : > { %s566_s21 = scalar_select %p89_p1, %s496_s14, %s91_s19  }
   0x9   : > { %p568_p5 = por %p102_p2, %p101_p0  ;;  %p572_p6 = por %p108_p4, %p107_p3 }
   0xa   : > { %p370_p7 = scmp.ge.s32.totalorder %s500_s15, 1  ;;  %p139_p8 = scmp.lt.s32.totalorder %s500_s15, 3 }
   0xc   : > { %p140_p9 = pnand %p370_p7, %p139_p8 }
   0xd   : > { %p162_p10 = scmp.lt.s32.totalorder (!%p140_p9), %s551_s16, 1  ;;  %v502_v0 = vmov (!%p140_p9), 0   ;;  %v373_v2 = vld [vmem:[%s658_s1] ss:$0 sm:$0xff] (!%p140_p9)  ;;  %v503_v17 = vmov (!%p140_p9), 683565275  }
   0xe   : > { %143 = sbr.rel (%p140_p9) target bundleno = 251 (0xfb), region = 32  ;;  %433 = vset.pattern.permute.xlu0 (!%p140_p9), %v502_v0  ;;  %v374_v3 = vld [vmem:[%s659_s2] ss:$0 sm:$0xff] (!%p140_p9)  ;;  %v504_v19 = vmov (!%p140_p9), 2475754826   ;;  %s159_s6 = sand.u32 (!%p140_p9), 1, %s492_s13  }
   0xf   : > { %v505_v22 = vmov (!%p140_p9), 2131351028   ;;  %v506_v25 = vmov (!%p140_p9), 2102212464   ;;  %v507_v28 = vmov (!%p140_p9), 920167782  }
  0x10   : > { %v508_v31 = vmov (!%p140_p9), 1326507024   ;;  %s371_s7 = sshll.u32 (!%p140_p9), %s159_s6, 3  ;;  %s380_s8 = sshll.u32 (!%p140_p9), %s551_s16, 7  ;;  %vm292_vm12 = vcmask (!%p140_p9), 523264  }
  0x11   : > { %s161_s9 = scalar_lea.vmem (!%p140_p9), [#allocation2], %s371_s7  ;;  %s615_s19 = scalar_lea.hbm (!%p140_p9), %s660_s3, %s380_s8 }
  0x12   : > { %s308_s10 = sshll.u32 (!%p140_p9), %s161_s9, 4  ;;  %s617_s10 = int_to_ptr.vmem [resolvable:$true] %s308_s10 }
  0x13   : > { %s438_s20 = scalar_lea.vmem (!%p140_p9), %s617_s10, 128 }
  0x14   : > { %p439_p11 = scmp.ne.s32.totalorder (!%p140_p9), %s617_s10, %s438_s20 }
  0x15   : > { %s163_s24 = scalar_select %p162_p10, %s551_s16, 1 }
  0x16   : > { %s295_s16 = scalar_lea.sflag [#allocation3], %s159_s6  ;;  %p440_p12 = pnand %p439_p11, %p568_p5 }
  0x17   : > { %s372_s25 = sshll.u32 %s163_s24, 3  ;;  %s509_s24 = smov [#allocation2]  }
  0x18   : > { %s165_s28 = scalar_lea.vmem %s657_s0, %s372_s25  ;;  %p441_p13 = pneg %p440_p12 }
  0x19   : > { %v166_v1 = vld [vmem:[%s165_s28] sm:$0xff]  ;;  %s442_s25 = sshll.u32 %s509_s24, 4  ;;  %s443_s25 = int_to_ptr.vmem [resolvable:$false] %s442_s25 }
  0x1a   : > { %170 = vperm.xlu0 %433, %v166_v1   ;;  %s444_s26 = scalar_lea.vmem %s443_s25, 256  ;;  %p445_p0 = scmp.lt.s32.totalorder %s617_s10, %s443_s25 }
  0x1b   : > { %p446_p1 = scmp.lt.s32.totalorder %s444_s26, %s438_s20 }
  0x1d   : > { %p447_p2 = por %p446_p1, %p445_p0 }
  0x1f   : > { %p448_p3 = pnand %p447_p2, %p441_p13 }
  0x99   : > { %v171_v4 = vpop.permute.xlu0 %170 }
  0x9a   : > { %v179_v5 = vmul.f32 %v373_v2, %v171_v4 }
  0x9c   : > { %v589_v6 = vadd.f32 %v374_v3, %v179_v5 }
  0x9e   : > { %v191_v7 = vand.u32 2139095040, %v589_v6  ;;  %v188_v11 = vand.u32 2147483647, %v589_v6  ;;  %vm190_vm7 = vcmp.lt.s32.totalorder %v589_v6, 0  ;;  %vm280_vm13 = vweird.f32 %v589_v6 }
  0xa0   : > { %v192_v8 = vshrl.u32 %v191_v7, 23  ;;  %v195_v14 = vand.u32 8388607, %v188_v11  ;;  %vm189_vm8 = vcmp.le.f32.partialorder %v188_v11, 0.7853982 }
  0xa2   : > { %v375_v9 = vadd.s32 4294967169, %v192_v8  ;;  %v196_v33 = vor.u32 8388608, %v195_v14 }
  0xa4   : > { %v198_v10 = vadd.s32 1, %v375_v9  ;;  %v236_v47 = vshll.u32 %v196_v33, 8 }
  0xa6   : > { %vm199_vm0 = vcmp.gt.s32.totalorder %v198_v10, 0 }
  0xa7   : > { %v200_v12 = vsel %vm199_vm0, %v198_v10, 0 }
  0xa8   : > { %v202_v13 = vand.u32 31, %v200_v12  ;;  %v201_v16 = vshrl.u32 %v200_v12, 5 }
  0xaa   : > { %v203_v15 = vsub.s32 32, %v202_v13  ;;  %v205_v18 = vshll.u32 %v503_v17, %v202_v13  ;;  %v208_v20 = vshll.u32 %v504_v19, %v202_v13  ;;  %v211_v24 = vshll.u32 %v505_v22, %v202_v13 }
  0xab   : > { %v214_v27 = vshll.u32 %v506_v25, %v202_v13  ;;  %v217_v30 = vshll.u32 %v507_v28, %v202_v13  ;;  %vm220_vm1 = vcmp.lt.s32.totalorder %v201_v16, 1  ;;  %vm223_vm2 = vcmp.lt.s32.totalorder %v201_v16, 4 }
  0xac   : > { %v206_v21 = vshrl.u32 %v504_v19, %v203_v15  ;;  %v209_v23 = vshrl.u32 %v505_v22, %v203_v15  ;;  %v212_v26 = vshrl.u32 %v506_v25, %v203_v15  ;;  %v215_v29 = vshrl.u32 %v507_v28, %v203_v15 }
  0xad   : > { %v218_v32 = vshrl.u32 %v508_v31, %v203_v15  ;;  %v204_v42 = vshrl.u32 %v503_v17, %v203_v15  ;;  %vm222_vm3 = vcmp.lt.s32.totalorder %v201_v16, 3  ;;  %vm221_vm4 = vcmp.lt.s32.totalorder %v201_v16, 2 }
  0xae   : > { %v207_v34 = vor.u32 %v206_v21, %v205_v18  ;;  %v210_v35 = vor.u32 %v209_v23, %v208_v20  ;;  %v213_v36 = vor.u32 %v212_v26, %v211_v24  ;;  %v216_v37 = vor.u32 %v215_v29, %v214_v27 }
  0xaf   : > { %v219_v38 = vor.u32 %v218_v32, %v217_v30 }
  0xb0   : > { %v225_v39 = vsel %vm223_vm2, %v213_v36, 2102212464  ;;  %v228_v40 = vsel %vm220_vm1, %v207_v34, %v210_v35  ;;  %v232_v41 = vsel %vm220_vm1, %v210_v35, %v213_v36  ;;  %v229_v43 = vsel %vm223_vm2, %v216_v37, 920167782 }
  0xb1   : > { %v233_v44 = vsel %vm223_vm2, %v219_v38, 1326507024  ;;  %v230_v45 = vsel %vm222_vm3, %v213_v36, %v229_v43  ;;  %v224_v48 = vsel %vm220_vm1, %v204_v42, %v207_v34  ;;  %v226_v49 = vsel %vm222_vm3, %v210_v35, %v225_v39 }
  0xb2   : > { %v234_v46 = vsel %vm222_vm3, %v216_v37, %v233_v44  ;;  %v231_v50 = vsel %vm221_vm4, %v228_v40, %v230_v45  ;;  %v227_v56 = vsel %vm221_vm4, %v224_v48, %v226_v49 }
  0xb3   : > { %v235_v51 = vsel %vm221_vm4, %v232_v41, %v234_v46  ;;  %v598_v54 = vmul.u32.u64.low %v236_v47, %v231_v50  ;;  %v599_v55 = vmul.u32.u64.high %v236_v47, %v231_v50, %v598_v54  ;;  %v243_v58 = vmul.u32 %v236_v47, %v227_v56 }
  0xb4   : > { %v595_v52 = vmul.u32.u64.low %v236_v47, %v235_v51  ;;  %v596_v53 = vmul.u32.u64.high %v236_v47, %v235_v51, %v595_v52 }
  0xb5   : > { %v246_v57 = vadd.s32 1, %v599_v55 }
  0xb6   : > { %vm245_vm5 = vc.u32 %v596_v53, %v598_v54  ;;  %v244_v7 = vadd.s32 %v598_v54, %v596_v53 }
  0xb7   : > { %v247_v59 = vsel %vm245_vm5, %v246_v57, %v599_v55 }
  0xb8   : > { %v248_v60 = vadd.s32 %v247_v59, %v243_v58 }
  0xba   : > { %v249_v61 = vadd.s32 536870912, %v248_v60 }
  0xbc   : > { %v250_v62 = vshrl.u32 %v249_v61, 30 }
  0xbe   : > { %v251_v63 = vshll.u32 %v250_v62, 30  ;;  %v274_v20 = vsub.s32 4, %v250_v62 }
  0xc0   : > { %v252_v0 = vsub.s32 %v248_v60, %v251_v63  ;;  %v275_v23 = vsel %vm190_vm7, %v274_v20, %v250_v62 }
  0xc1   : > { %v277_v25 = vsel %vm189_vm8, 0, %v275_v23 }
  0xc2   : > { %v254_v1 = vsub.s32 0, %v252_v0  ;;  %v281_v26 = vadd.s32 3, %v277_v25 }
  0xc4   : > { %v376_v2 = vmin.u32 %v254_v1, %v252_v0  ;;  %v282_v27 = vand.u32 3, %v281_v26 }
  0xc6   : > { %v256_v3 = vclz %v376_v2  ;;  %vm287_vm9 = vcmp.eq.s32.totalorder %v282_v27, 2  ;;  %vm284_vm10 = vcmp.eq.s32.totalorder %v282_v27, 0  ;;  %vm283_vm11 = vcmp.lt.s32.totalorder %v282_v27, 2 }
  0xc8   : > { %v377_v4 = vadd.s32 4294967294, %v256_v3 }
  0xca   : > { %vm378_vm6 = vcmp.lt.s32.totalorder %v377_v4, 0 }
  0xcb   : > { %v259_v5 = vsel %vm378_vm6, 0, %v377_v4 }
  0xcc   : > { %v260_v8 = vsub.s32 32, %v259_v5  ;;  %v264_v9 = vsub.s32 4294967266, %v259_v5  ;;  %v261_v10 = vshll.u32 %v252_v0, %v259_v5 }
  0xce   : > { %v262_v12 = vshrl.u32 %v244_v7, %v260_v8  ;;  %v265_v13 = vadd.s32 127, %v264_v9 }
  0xd0   : > { %v263_v14 = vor.u32 %v262_v12, %v261_v10  ;;  %v266_v15 = vshll.u32 %v265_v13, 23 }
  0xd2   : > { %v267_v16 = vor.u32 4788187, %v266_v15  ;;  %v270_v18 = vcvt.s32.f32 %v263_v14 }
  0xd4   : > { %v268_v17 = vand.u32 2147483647, %v267_v16 }
  0xd6   : > { %v271_v19 = vmul.f32 %v270_v18, %v268_v17 }
  0xd8   : > { %v272_v21 = vxor.u32 2147483648, %v271_v19 }
  0xda   : > { %v273_v22 = vsel %vm190_vm7, %v272_v21, %v271_v19 }
  0xdb   : > { %v276_v24 = vsel %vm189_vm8, %v589_v6, %v273_v22 }
  0xdc   : > { %434 = vcosq.f32 %v276_v24 }
  0xdd   : > { %436 = vsinq.f32 %v276_v24 }
  0xe6   : > { %v435_v28 = vpop.eup %434 }
  0xe7   : > { %v437_v29 = vpop.eup %436  ;;  %v288_v30 = vxor.u32 2147483648, %v435_v28 }
  0xe8   : > { %v285_v31 = vxor.u32 2147483648, %v437_v29 }
  0xe9   : > { %v289_v11 = vsel %vm287_vm9, %v288_v30, %v437_v29 }
  0xea   : > { %v286_v32 = vsel %vm284_vm10, %v435_v28, %v285_v31 }
  0xeb   : > { %v290_v33 = vsel %vm283_vm11, %v286_v32, %v289_v11 }
  0xec   : > { %v291_v34 = vsel %vm280_vm13, nan, %v290_v33 }
  0xed   : > { %293 = vst.msk [vmem:[%s161_s9] sm:$0xff] %vm292_vm12, %v291_v34 }
  0xee   : > { %451 = shalt.err (!%p448_p3)
}
  0xef   : > { %s452_s27 = scalar_lea.hbm %s615_s19, 128  ;;  %s456_s30 = scalar_lea.hbm %s660_s3, 256 }
  0xf0   : > { %p453_p4 = scmp.ne.s32.totalorder %s615_s19, %s452_s27  ;;  %p457_p9 = scmp.lt.u32.totalorder %s615_s19, %s660_s3 }
  0xf1   : > { %p458_p10 = scmp.lt.u32.totalorder %s456_s30, %s452_s27  ;;  %p460_p12 = scmp.lt.u32.totalorder %s452_s27, %s615_s19 }
  0xf2   : > { %p454_p7 = pnand %p453_p4, %p568_p5 }
  0xf3   : > { %p459_p11 = por %p458_p10, %p457_p9 }
  0xf4   : > { %p455_p8 = pneg %p454_p7 }
  0xf5   : > { %p461_p13 = por %p460_p12, %p459_p11 }
  0xf7   : > { %p462_p0 = pnand %p461_p13, %p455_p8 }
  0xf9   : > { %465 = shalt.err (!%p462_p0)
}
  0xfa   : > { %387 = dma.vmem_to_hbm [thread:$0]  (%p568_p5), %s617_s10, 128, %s615_s19, %s295_s16  }
  0xfb PF: > { %p393_p1 = scmp.ge.s32.totalorder %s500_s15, 2  ;;  %s320_s6 = sand.u32 1, %s488_s12  }
  0xfc   : > { %s321_s7 = scalar_lea.sflag [#allocation3], %s320_s6 }
  0xfd   : > { %p390_p2 = pnand %p393_p1, %p572_p6 }
  0xff   : > { %483 = dma.done.wait (!%p390_p2), %s321_s7, 128  }
 0x100   : > { %485 = vsyncadd (!%p390_p2), %s321_s7, 4294967168  ;;  %p13_p3 = scmp.ge.s32.totalorder %s555_s18, 4   ;;  %s663_s12 = smov %s492_s13 }
 0x101   : > { %s664_s13 = smov %s496_s14  ;;  %s665_s14 = smov %s566_s21 }
 0x102   : > { %s666_s15 = smov %s555_s18  ;;  %15 = sbr.rel (!%p13_p3) target bundleno = 3 (0x3), region = 67 }
 0x109   :  { %326 = vsyncpa [#allocation3], 1 }
 0x10a   :  { %328 = vsyncpa [#allocation3 + $0x1], 1 }

</bundles_post_ra>
